<compile_context>
chip_gen: v7x
topology: tpu7x:2x2x1
jax: 0.10.0
libtpu: 0.0.40
codegen_flags: <defaults>
</compile_context>

<pallas_src>
import functools

import jax
import jax.numpy as jnp
import numpy as np
from jax.experimental import pallas as pl
from jax.experimental.pallas import tpu as pltpu


def _normalize_kernel(x_ref, scale_ref, bias_ref, o_ref):
    # (x - mean) / std == x * (1/std) + (-mean/std); scale/bias are (tile_rows, 1)
    # f32 vectors broadcast along the lane axis -> one fused VPU op per vreg under
    # a purely HBM-bound critical path.
    o_ref[...] = (x_ref[...] * scale_ref[...] + bias_ref[...]).astype(o_ref.dtype)


def _round_down(x, m):
    return (x // m) * m


def _sublane_multiple(dtype):
    # Sub-32-bit dtypes pack along sublanes: 8 rows (f32), 16 (bf16/f16), 32 (int8/fp8).
    return {4: 8, 2: 16, 1: 32}.get(np.dtype(dtype).itemsize, 8)


def _device_kind():
    try:
        return jax.devices()[0].device_kind.lower()
    except Exception:
        return ""


def _target_block_bytes():
    kind = _device_kind()
    if "v7" in kind:
        return 6 * 1024 * 1024   # 4 bufs x 6 MiB = 24 MiB < 32 MiB scoped / 64 MiB phys
    if "v6" in kind:
        return 4 * 1024 * 1024   # 16 MiB of buffers, well under 32 MiB scoped default
    if "v5" in kind:
        return 2 * 1024 * 1024   # 8 MiB of buffers, under v5e's 16 MiB scoped default
    return 4 * 1024 * 1024


def _num_tensorcores():
    # v7x has 2 TensorCores per chip; v5e/v6e have 1.
    return 2 if "v7" in _device_kind() else 1


def _normalize_impl(x, scale_c, bias_c, donate):
    """x: (N, C, H, W). scale_c/bias_c: numpy f32 (C,) compile-time constants."""
    N, C, H, W = x.shape
    rows, cols = N * C, H * W

    # Lane-dense 2D view: one row per (n, c) plane, H*W on the lane axis.
    x2 = x.reshape(rows, cols)

    # Per-row affine constants, kept in f32. Row index = n*C + c -> tile C values
    # N times. Pure numpy -> embedded as constants, zero per-call XLA ops.
    scale_rows = jnp.asarray(np.tile(scale_c, N).reshape(rows, 1))
    bias_rows = jnp.asarray(np.tile(bias_c, N).reshape(rows, 1))

    itemsize = np.dtype(x.dtype).itemsize
    sublane = _sublane_multiple(x.dtype)
    target_bytes = _target_block_bytes()
    min_steps = _num_tensorcores()

    row_bytes = cols * itemsize
    if sublane * row_bytes <= target_bytes:
        # Fat row slabs with the full H*W on the lane axis (unmasked lane-dense stores).
        tile_cols = cols
        max_rows = max(sublane, _round_down(target_bytes // row_bytes, sublane))
        tile_rows = rows if rows <= max_rows else max_rows
    else:
        # Column-blocking fallback for very large spatial planes: minimal sublane-high
        # row tile, lane tile a large multiple of 128 sized to the slab budget.
        tile_rows = rows if rows <= sublane else sublane
        max_cols = max(128, _round_down(target_bytes // (tile_rows * itemsize), 128))
        tile_cols = cols if cols <= max_cols else max_cols

    row_steps = pl.cdiv(rows, tile_rows)
    col_steps = pl.cdiv(cols, tile_cols)

    # On a 2-TC chip (v7x), make sure there are >= 2 grid steps so the "parallel"
    # axes can shard work across both TensorCores.
    if min_steps > 1 and row_steps * col_steps < min_steps and rows >= min_steps * sublane:
        tile_rows = max(sublane, _round_down(pl.cdiv(rows, min_steps), sublane))
        row_steps = pl.cdiv(rows, tile_rows)
    # TODO(synk): verify in xprof that both v7x cores run; if plain "parallel"
    # doesn't shard, switch the row axis to pltpu.CORE_PARALLEL.

    out2 = pl.pallas_call(
        _normalize_kernel,
        out_shape=jax.ShapeDtypeStruct((rows, cols), x.dtype),
        grid=(row_steps, col_steps),
        in_specs=[
            pl.BlockSpec((tile_rows, tile_cols), lambda i, j: (i, j)),
            pl.BlockSpec((tile_rows, 1), lambda i, j: (i, 0)),
            pl.BlockSpec((tile_rows, 1), lambda i, j: (i, 0)),
        ],
        out_specs=pl.BlockSpec((tile_rows, tile_cols), lambda i, j: (i, j)),
        compiler_params=pltpu.CompilerParams(
            dimension_semantics=("parallel", "parallel"),
        ),
        input_output_aliases=({0: 0} if donate else {}),
    )(x2, scale_rows, bias_rows)

    return out2.reshape(N, C, H, W)


def make_normalizer(mean=(0.4914, 0.4822, 0.4465), std=(0.2023, 0.1994, 0.201), *,
                    donate=False):
    """Returns a jitted fn equivalent to PyTorch NormalizeInput.forward.

    The per-channel divides are done once on the host; inside the jitted function
    they are compile-time constants. Set donate=True only at call sites that can
    donate x (the input buffer is reused for the output).
    """
    mean = np.asarray(mean, dtype=np.float32).reshape(-1)
    std = np.asarray(std, dtype=np.float32).reshape(-1)
    scale_c = (1.0 / std).astype(np.float32)          # 1/std
    bias_c = (-mean * scale_c).astype(np.float32)     # -mean/std

    @functools.partial(jax.jit, donate_argnums=((0,) if donate else ()))
    def normalize(x):
        assert x.ndim == 4, "expected NCHW input"
        assert x.shape[1] == scale_c.shape[0], "channel count must match mean/std"
        return _normalize_impl(x, scale_c, bias_c, donate)

    return normalize


if __name__ == "__main__":
    # Module defaults (CIFAR-10 stats) -> C must be 3.
    mean = (0.4914, 0.4822, 0.4465)
    std = (0.2023, 0.1994, 0.201)
    normalize = make_normalizer(mean, std)

    key = jax.random.PRNGKey(0)
    x = jax.random.uniform(key, (2, 3, 16, 16), dtype=jnp.float32)

    out = jax.block_until_ready(normalize(x))

    mean_a = jnp.asarray(mean, dtype=jnp.float32).reshape(1, -1, 1, 1)
    std_a = jnp.asarray(std, dtype=jnp.float32).reshape(1, -1, 1, 1)
    ref = (x - mean_a) / std_a

    assert out.shape == x.shape and out.dtype == x.dtype
    assert jnp.allclose(out, ref, atol=1e-5, rtol=1e-5)

    print("KERNEL_OK")
</pallas_src>

<mosaic_0001>
module attributes {stable_mosaic.version = 11 : i64} {
  func.func @_normalize_kernel(%arg0: i32, %arg1: i32, %arg2: memref<6x256xf32, #tpu.memory_space<vmem>>, %arg3: memref<6x1xf32, #tpu.memory_space<vmem>>, %arg4: memref<6x1xf32, #tpu.memory_space<vmem>>, %arg5: memref<6x256xf32, #tpu.memory_space<vmem>>) attributes {dimension_semantics = [#tpu.dimension_semantics<parallel>, #tpu.dimension_semantics<parallel>], iteration_bounds = array<i64: 1, 1>, scalar_prefetch = 0 : i64, scratch_operands = 0 : i64, tpu.core_type = #tpu.core_type<tc>, window_params = [{transform_indices = @transform_0, window_bounds = array<i64: 6, 256>}, {transform_indices = @transform_1, window_bounds = array<i64: 6, 1>}, {transform_indices = @transform_2, window_bounds = array<i64: 6, 1>}, {transform_indices = @transform_3, window_bounds = array<i64: 6, 256>}]} {
    %c0 = arith.constant 0 : index
    %c0_0 = arith.constant 0 : index
    %0 = vector.load %arg2[%c0, %c0_0] : memref<6x256xf32, #tpu.memory_space<vmem>>, vector<6x256xf32>
    %c0_1 = arith.constant 0 : index
    %c0_2 = arith.constant 0 : index
    %1 = vector.load %arg3[%c0_1, %c0_2] : memref<6x1xf32, #tpu.memory_space<vmem>>, vector<6x1xf32>
    %2 = vector.broadcast %1 : vector<6x1xf32> to vector<6x256xf32>
    %3 = arith.mulf %0, %2 : vector<6x256xf32>
    %c0_3 = arith.constant 0 : index
    %c0_4 = arith.constant 0 : index
    %4 = vector.load %arg4[%c0_3, %c0_4] : memref<6x1xf32, #tpu.memory_space<vmem>>, vector<6x1xf32>
    %5 = vector.broadcast %4 : vector<6x1xf32> to vector<6x256xf32>
    %6 = arith.addf %3, %5 : vector<6x256xf32>
    %c0_5 = arith.constant 0 : index
    %c0_6 = arith.constant 0 : index
    %7 = vector.load %arg5[%c0_5, %c0_6] : memref<6x256xf32, #tpu.memory_space<vmem>>, vector<6x256xf32>
    tpu.vector_store %arg5[%c0_5, %c0_6], %6 {strides = array<i32>} : memref<6x256xf32, #tpu.memory_space<vmem>>, vector<6x256xf32>,
    return
  }
  func.func @transform_0(%arg0: i32, %arg1: i32) -> (i32, i32) {
    %c0_i32 = arith.constant 0 : i32
    return %arg0, %arg1 : i32, i32
  }
  func.func @transform_1(%arg0: i32, %arg1: i32) -> (i32, i32) {
    %c0_i32 = arith.constant 0 : i32
    %c0_i32_0 = arith.constant 0 : i32
    return %arg0, %c0_i32 : i32, i32
  }
  func.func @transform_2(%arg0: i32, %arg1: i32) -> (i32, i32) {
    %c0_i32 = arith.constant 0 : i32
    %c0_i32_0 = arith.constant 0 : i32
    return %arg0, %c0_i32 : i32, i32
  }
  func.func @transform_3(%arg0: i32, %arg1: i32) -> (i32, i32) {
    %c0_i32 = arith.constant 0 : i32
    return %arg0, %arg1 : i32, i32
  }
}

</mosaic_0001>

<bundles_post_ra>
// kernel: normalize.1
= control target key start
LH: loop header
LB: loop body
LE: loop exit
PB: predicated region body
PF: predicated region fallthrough
CT: control target
= control target key end

     0   :  { %v40_v0 = vmov 0   ;;  %s79_s1 = inlined_call_operand.vmem [shape: f32[6,1], index: 1, kind: input, shape index: {}]   ;;  %s80_s2 = inlined_call_operand.vmem [shape: f32[6,1], index: 2, kind: input, shape index: {}]   ;;  %s81_s0 = inlined_call_operand.vmem [shape: f32[6,256], index: 0, kind: input, shape index: {}]   ;;  %s82_s3 = inlined_call_operand.vmem [shape: f32[6,256], index: 3, kind: output, shape index: {}]  }
   0x1   :  { %39 = vset.pattern.permute.xlu0 %v40_v0  ;;  %v16_v1 = vld [vmem:[%s79_s1] sm:$0x3f]  ;;  %v15_v5 = vld [vmem:[%s81_s0 + $0x8] sm:$0x3f] }
   0x2   :  { %19 = vperm.xlu0 %39, %v16_v1   ;;  %v24_v2 = vld [vmem:[%s80_s2] sm:$0x3f] }
   0x3   :  { %v14_v4 = vld [vmem:[%s81_s0] sm:$0x3f] }
   0x6   :  { %27 = vperm.xlu0 %39, %v24_v2  }
  0x81   :  { %v20_v3 = vpop.permute.xlu0 %19 }
  0x82   :  { %v22_v6 = vmul.f32 %v20_v3, %v14_v4  ;;  %v23_v7 = vmul.f32 %v20_v3, %v15_v5 }
  0x85   :  { %v28_v8 = vpop.permute.xlu0 %27 }
  0x86   :  { %v30_v9 = vadd.f32 %v28_v8, %v22_v6  ;;  %v31_v10 = vadd.f32 %v28_v8, %v23_v7 }
  0x88   :  { %32 = vst [vmem:[%s82_s3] sm:$0x3f] %v30_v9  ;;  %33 = vst [vmem:[%s82_s3 + $0x8] sm:$0x3f] %v31_v10 }

</bundles_post_ra>
